<compile_context>
chip_gen: v7x
topology: tpu7x:2x2x1
jax: 0.10.0
libtpu: 0.0.40
codegen_flags: <defaults>
</compile_context>

<pallas_src>
import functools

import jax
import jax.numpy as jnp
from jax import lax
from jax.experimental import pallas as pl
from jax.experimental.pallas import tpu as pltpu

DECAY = 0.2
THRESH = 0.5  # standard STBP spiking threshold used by act_fun


def _round_up(x, m):
    return (x + m - 1) // m * m


def _batch_dims(batch):
    """(row-tile tm, padded batch Bp). tm covers the batch (one or two blocks)."""
    bp8 = _round_up(batch, 8)
    if bp8 < 32:
        return bp8, bp8                       # single row block (tiny batch)
    if bp8 <= 1024:
        bp = _round_up(bp8, 32)
        return bp // 2, bp                    # two row blocks (one per v7x TensorCore)
    tm = 512
    return tm, _round_up(bp8, tm)


def _feat_dims(input_dim, output_dim):
    """(column-tile tn, padded K, padded N). Whole weight resident when it fits."""
    kp = _round_up(input_dim, 128)
    np_ = _round_up(output_dim, 128)
    if kp * np_ * 2 * 2 <= 16 * 1024 * 1024:   # double-buffered bf16 W tile
        tn = np_                               # one j block: W + x each streamed once
    else:
        tn = 128
        for cand in (1024, 512, 256):
            if np_ % cand == 0 and kp * cand * 2 * 2 <= 16 * 1024 * 1024:
                tn = cand
                break
    return tn, kp, np_


def _snn_linear_kernel(x_ref, w_ref, b_ref, mem_in_ref, spk_in_ref, sum_in_ref,
                       hist_ref, mem_ref, spk_ref, sum_ref, *, batch, tm):
    t = pl.program_id(2)

    @pl.when(t == 0)
    def _():
        # Load the carried state into the VMEM-resident output blocks once;
        # they stay resident across the whole T loop for this (i, j) tile.
        mem_ref[...] = mem_in_ref[...]
        spk_ref[...] = spk_in_ref[...]
        sum_ref[...] = sum_in_ref[...]

    # x tile [tm, Kp] bf16 @ w tile [Kp, tn] bf16 -> canonical MXU matmul with
    # f32 accumulation; bias folded in here.
    fc = jnp.dot(x_ref[...], w_ref[...], preferred_element_type=jnp.float32)
    fc = fc + b_ref[...]

    # Zero padded batch rows so the persistent padded state stays exactly 0
    # there (otherwise the bias leaks in and sumspike grows across steps).
    row = pl.program_id(0) * tm + lax.broadcasted_iota(jnp.int32, fc.shape, 0)
    fc = jnp.where(row < batch, fc, 0.0)

    mem_new = mem_ref[...] * (DECAY * (1.0 - spk_ref[...])) + fc
    spike_new = (mem_new > THRESH).astype(jnp.float32)

    mem_ref[...] = mem_new
    spk_ref[...] = spike_new
    sum_ref[...] = sum_ref[...] + spike_new
    hist_ref[...] = spike_new.astype(hist_ref.dtype)   # per-step spike output (bf16, exact 0/1)


def snn_linear_prepare_params(weight, bias):
    """One-time parameter prep: pad, cast to bf16, transpose to [Kp, Np].

    weight: [N, K] f32 (PyTorch nn.Linear layout), bias: [N] f32.
    """
    out_dim, input_dim = weight.shape
    _, kp, np_ = _feat_dims(input_dim, out_dim)
    w_kn = jnp.pad(weight, ((0, np_ - out_dim), (0, kp - input_dim)))
    w_kn = jnp.asarray(w_kn.T, dtype=jnp.bfloat16)                      # [Kp, Np]
    bias_pad = jnp.pad(bias, (0, np_ - out_dim)).reshape(1, np_).astype(jnp.float32)
    return w_kn, bias_pad


def snn_linear_init_state(batch, output_dim):
    """Zero-initialised carried state (mem, spike, sumspike) in padded [Bp, Np] layout."""
    _, bp = _batch_dims(batch)
    np_ = _round_up(output_dim, 128)
    mem = jnp.zeros((bp, np_), jnp.float32)
    spike = jnp.zeros((bp, np_), jnp.float32)
    sumspike = jnp.zeros((bp, np_), jnp.float32)
    return mem, spike, sumspike


@functools.partial(jax.jit, static_argnames=("out_dim",), donate_argnums=(3, 4, 5))
def snn_linear_forward(x_seq, w_kn, bias_pad, mem_p, spk_p, sum_p, *, out_dim):
    """Run T SNN time steps with the weight and state resident in VMEM.

    x_seq:    [T, B, K] f32 inputs (one per time step).
    w_kn:     [Kp, Np] bf16 from snn_linear_prepare_params.
    bias_pad: [1, Np]  f32  from snn_linear_prepare_params.
    mem_p / spk_p / sum_p: padded [Bp, Np] f32 carried state (donated, updated in place).

    Returns (spike_seq [T, B, N] f32, (mem_p, spk_p, sum_p) updated padded state).
    """
    T, B, K = x_seq.shape
    tm, bp = _batch_dims(B)
    tn, kp, np_ = _feat_dims(K, out_dim)
    assert w_kn.shape == (kp, np_), (w_kn.shape, (kp, np_))
    assert mem_p.shape == (bp, np_), (mem_p.shape, (bp, np_))

    # Per-call activation pad + bf16 cast (the weight/state pads are hoisted out).
    x_p = jnp.pad(x_seq, ((0, 0), (0, bp - B), (0, kp - K))).astype(jnp.bfloat16)

    grid = (bp // tm, np_ // tn, T)
    state_spec = pl.BlockSpec((tm, tn), lambda i, j, t: (i, j))

    # Double-buffered VMEM footprint estimate -> scoped limit, capped at 48 MiB
    # so the same config stays safe on v7x's 64 MiB VMEM.
    est = 2 * (tm * kp * 2 + kp * tn * 2 + tn * 4 + 6 * tm * tn * 4 + tm * tn * 2)
    vmem_limit = min(max(32 * 1024 * 1024, int(1.25 * est)), 48 * 1024 * 1024)

    kernel = functools.partial(_snn_linear_kernel, batch=B, tm=tm)

    hist, mem_new, spk_new, sum_new = pl.pallas_call(
        kernel,
        out_shape=(
            jax.ShapeDtypeStruct((T, bp, np_), jnp.bfloat16),   # per-step spikes
            jax.ShapeDtypeStruct((bp, np_), jnp.float32),       # mem
            jax.ShapeDtypeStruct((bp, np_), jnp.float32),       # spike
            jax.ShapeDtypeStruct((bp, np_), jnp.float32),       # sumspike
        ),
        grid_spec=pltpu.PrefetchScalarGridSpec(
            num_scalar_prefetch=0,
            grid=grid,
            in_specs=[
                pl.BlockSpec((None, tm, kp), lambda i, j, t: (t, i, 0)),   # x_t
                pl.BlockSpec((kp, tn), lambda i, j, t: (0, j)),            # W [K, N]
                pl.BlockSpec((1, tn), lambda i, j, t: (0, j)),             # bias
                state_spec,                                                # mem in
                state_spec,                                                # spike in
                state_spec,                                                # sumspike in
            ],
            out_specs=(
                pl.BlockSpec((None, tm, tn), lambda i, j, t: (t, i, j)),   # spike hist
                state_spec, state_spec, state_spec,
            ),
        ),
        # In-place carried state: mem/spike/sumspike inputs alias outputs 1..3.
        input_output_aliases={3: 1, 4: 2, 5: 3},
        compiler_params=pltpu.CompilerParams(
            dimension_semantics=("parallel", "parallel", "arbitrary"),
            vmem_limit_bytes=vmem_limit,
        ),
    )(x_p, w_kn, bias_pad, mem_p, spk_p, sum_p)

    spike_seq = hist[:, :B, :out_dim].astype(jnp.float32)
    return spike_seq, (mem_new, spk_new, sum_new)


def init_linear_params(key, input_dim, output_dim):
    # Mirrors nn.Linear defaults: weight, bias ~ U(-1/sqrt(in), 1/sqrt(in)).
    kw, kb = jax.random.split(key)
    bound = 1.0 / jnp.sqrt(jnp.float32(input_dim))
    weight = jax.random.uniform(kw, (output_dim, input_dim),
                                minval=-bound, maxval=bound, dtype=jnp.float32)
    bias = jax.random.uniform(kb, (output_dim,),
                              minval=-bound, maxval=bound, dtype=jnp.float32)
    return weight, bias


if __name__ == "__main__":
    key = jax.random.PRNGKey(0)
    k_x, k_p = jax.random.split(key)

    # Classifier layer of the module: cfg_fc -> 620 inputs, 11 classes; small batch.
    batch, input_dim, output_dim = 4, 620, 11
    steps_per_call, n_calls = 2, 2
    total_steps = steps_per_call * n_calls

    weight, bias = init_linear_params(k_p, input_dim, output_dim)
    x_all = jax.random.normal(k_x, (total_steps, batch, input_dim), dtype=jnp.float32)

    # One-time param prep (pad + bf16 + transpose) and persistent padded state.
    w_kn, bias_pad = snn_linear_prepare_params(weight, bias)
    state = snn_linear_init_state(batch, output_dim)

    spikes = []
    for c in range(n_calls):
        x_seq = x_all[c * steps_per_call:(c + 1) * steps_per_call]
        spike_seq, state = snn_linear_forward(
            x_seq, w_kn, bias_pad, *state, out_dim=output_dim)
        spikes.append(spike_seq)
    spikes = jnp.concatenate(spikes, axis=0)
    jax.block_until_ready((spikes, state))

    # ---- reference: f32 state math, bf16 matmul (same precision as the kernel) ----
    w_bf = weight.astype(jnp.bfloat16)
    mem_r = jnp.zeros((batch, output_dim), jnp.float32)
    spk_r = jnp.zeros_like(mem_r)
    sum_r = jnp.zeros_like(mem_r)
    ref_spikes, ref_mems = [], []
    for t in range(total_steps):
        fc = jnp.dot(x_all[t].astype(jnp.bfloat16), w_bf.T,
                     preferred_element_type=jnp.float32) + bias
        mem_r = mem_r * DECAY * (1.0 - spk_r) + fc
        spk_r = (mem_r > THRESH).astype(jnp.float32)
        sum_r = sum_r + spk_r
        ref_spikes.append(spk_r)
        ref_mems.append(mem_r)
    ref_spikes = jnp.stack(ref_spikes)
    ref_mems = jnp.stack(ref_mems)

    mem_p, spk_p, sum_p = state
    mem_k = mem_p[:batch, :output_dim]
    spk_k = spk_p[:batch, :output_dim]
    sum_k = sum_p[:batch, :output_dim]

    # Membrane potential matches the (bf16-matmul) reference.
    assert jnp.allclose(mem_k, mem_r, atol=2e-3, rtol=2e-3)
    # Spikes match except (defensively) where mem is within tolerance of the threshold.
    safe_hist = jnp.abs(ref_mems - THRESH) > 5e-3
    assert bool(jnp.all(jnp.where(safe_hist, spikes == ref_spikes, True)))
    assert bool(jnp.all(jnp.where(safe_hist[-1], spk_k == ref_spikes[-1], True)))
    # Internal consistency of the carried state.
    assert jnp.array_equal(spk_k, spikes[-1])
    assert jnp.array_equal(sum_k, spikes.sum(axis=0))
    # Padded rows/cols of the persistent state stay exactly zero (in-kernel masking).
    assert not bool(jnp.any(mem_p[batch:])) and not bool(jnp.any(sum_p[batch:]))
    assert not bool(jnp.any(mem_p[:, output_dim:])) and not bool(jnp.any(sum_p[:, output_dim:]))

    print("KERNEL_OK")
</pallas_src>

<mosaic_0001>
module attributes {stable_mosaic.version = 11 : i64} {
  func.func @_snn_linear_kernel(%arg0: i32, %arg1: i32, %arg2: i32, %arg3: memref<1x8x640xbf16, #tpu.memory_space<vmem>>, %arg4: memref<640x128xbf16, #tpu.memory_space<vmem>>, %arg5: memref<1x128xf32, #tpu.memory_space<vmem>>, %arg6: memref<8x128xf32, #tpu.memory_space<vmem>>, %arg7: memref<8x128xf32, #tpu.memory_space<vmem>>, %arg8: memref<8x128xf32, #tpu.memory_space<vmem>>, %arg9: memref<1x8x128xbf16, #tpu.memory_space<vmem>>, %arg10: memref<8x128xf32, #tpu.memory_space<vmem>>, %arg11: memref<8x128xf32, #tpu.memory_space<vmem>>, %arg12: memref<8x128xf32, #tpu.memory_space<vmem>>) attributes {dimension_semantics = [#tpu.dimension_semantics<parallel>, #tpu.dimension_semantics<parallel>, #tpu.dimension_semantics<arbitrary>], iteration_bounds = array<i64: 1, 1, 2>, scalar_prefetch = 0 : i64, scratch_operands = 0 : i64, tpu.core_type = #tpu.core_type<tc>, window_params = [{transform_indices = @transform_0, window_bounds = array<i64: 1, 8, 640>}, {transform_indices = @transform_1, window_bounds = array<i64: 640, 128>}, {transform_indices = @transform_2, window_bounds = array<i64: 1, 128>}, {transform_indices = @transform_3, window_bounds = array<i64: 8, 128>}, {transform_indices = @transform_4, window_bounds = array<i64: 8, 128>}, {transform_indices = @transform_5, window_bounds = array<i64: 8, 128>}, {transform_indices = @transform_6, window_bounds = array<i64: 1, 8, 128>}, {transform_indices = @transform_7, window_bounds = array<i64: 8, 128>}, {transform_indices = @transform_8, window_bounds = array<i64: 8, 128>}, {transform_indices = @transform_9, window_bounds = array<i64: 8, 128>}]} {
    %c0_i32 = arith.constant 0 : i32
    %0 = arith.cmpi eq, %arg2, %c0_i32 : i32
    %1 = arith.extui %0 : i1 to i32
    %c0_i32_0 = arith.constant 0 : i32
    %2 = arith.cmpi ne, %1, %c0_i32_0 : i32
    scf.if %2 {
      %c0_26 = arith.constant 0 : index
      %c0_27 = arith.constant 0 : index
      %39 = vector.load %arg6[%c0_26, %c0_27] : memref<8x128xf32, #tpu.memory_space<vmem>>, vector<8x128xf32>
      %c0_28 = arith.constant 0 : index
      %c0_29 = arith.constant 0 : index
      %40 = vector.load %arg10[%c0_28, %c0_29] : memref<8x128xf32, #tpu.memory_space<vmem>>, vector<8x128xf32>
      tpu.vector_store %arg10[%c0_28, %c0_29], %39 {strides = array<i32>} : memref<8x128xf32, #tpu.memory_space<vmem>>, vector<8x128xf32>,
      %c0_30 = arith.constant 0 : index
      %c0_31 = arith.constant 0 : index
      %41 = vector.load %arg7[%c0_30, %c0_31] : memref<8x128xf32, #tpu.memory_space<vmem>>, vector<8x128xf32>
      %c0_32 = arith.constant 0 : index
      %c0_33 = arith.constant 0 : index
      %42 = vector.load %arg11[%c0_32, %c0_33] : memref<8x128xf32, #tpu.memory_space<vmem>>, vector<8x128xf32>
      tpu.vector_store %arg11[%c0_32, %c0_33], %41 {strides = array<i32>} : memref<8x128xf32, #tpu.memory_space<vmem>>, vector<8x128xf32>,
      %c0_34 = arith.constant 0 : index
      %c0_35 = arith.constant 0 : index
      %43 = vector.load %arg8[%c0_34, %c0_35] : memref<8x128xf32, #tpu.memory_space<vmem>>, vector<8x128xf32>
      %c0_36 = arith.constant 0 : index
      %c0_37 = arith.constant 0 : index
      %44 = vector.load %arg12[%c0_36, %c0_37] : memref<8x128xf32, #tpu.memory_space<vmem>>, vector<8x128xf32>
      tpu.vector_store %arg12[%c0_36, %c0_37], %43 {strides = array<i32>} : memref<8x128xf32, #tpu.memory_space<vmem>>, vector<8x128xf32>,
    } else {
    }
    %c0 = arith.constant 0 : index
    %c0_1 = arith.constant 0 : index
    %c0_2 = arith.constant 0 : index
    %3 = vector.load %arg3[%c0, %c0_1, %c0_2] : memref<1x8x640xbf16, #tpu.memory_space<vmem>>, vector<1x8x640xbf16>
    %4 = vector.shape_cast %3 : vector<1x8x640xbf16> to vector<8x640xbf16>
    %c0_3 = arith.constant 0 : index
    %c0_4 = arith.constant 0 : index
    %5 = vector.load %arg4[%c0_3, %c0_4] : memref<640x128xbf16, #tpu.memory_space<vmem>>, vector<640x128xbf16>
    %cst = arith.constant dense<0.000000e+00> : vector<8x128xf32>
    %6 = tpu.matmul %4, %5, %cst {dimension_numbers = #tpu.dot_dimension_numbers<[1], [0], [0], [1], [0, 0, 1, 1], [], []>} : vector<8x640xbf16>, vector<640x128xbf16>, vector<8x128xf32> -> vector<8x128xf32>
    %c0_5 = arith.constant 0 : index
    %c0_6 = arith.constant 0 : index
    %7 = vector.load %arg5[%c0_5, %c0_6] : memref<1x128xf32, #tpu.memory_space<vmem>>, vector<1x128xf32>
    %8 = vector.broadcast %7 : vector<1x128xf32> to vector<8x128xf32>
    %9 = arith.addf %6, %8 : vector<8x128xf32>
    %c8_i32 = arith.constant 8 : i32
    %10 = arith.muli %arg0, %c8_i32 : i32
    %11 = tpu.iota {dimensions = array<i32: 0>} : vector<8x128xi32>
    %12 = vector.broadcast %10 : i32 to vector<8x128xi32>
    %13 = arith.addi %12, %11 : vector<8x128xi32>
    %c4_i32 = arith.constant 4 : i32
    %14 = vector.broadcast %c4_i32 : i32 to vector<8x128xi32>
    %15 = arith.cmpi slt, %13, %14 : vector<8x128xi32>
    %cst_7 = arith.constant 0.000000e+00 : f32
    %16 = vector.broadcast %cst_7 : f32 to vector<8x128xf32>
    %17 = arith.select %15, %9, %16 : vector<8x128xi1>, vector<8x128xf32>
    %c0_8 = arith.constant 0 : index
    %c0_9 = arith.constant 0 : index
    %18 = vector.load %arg10[%c0_8, %c0_9] : memref<8x128xf32, #tpu.memory_space<vmem>>, vector<8x128xf32>
    %c0_10 = arith.constant 0 : index
    %c0_11 = arith.constant 0 : index
    %19 = vector.load %arg11[%c0_10, %c0_11] : memref<8x128xf32, #tpu.memory_space<vmem>>, vector<8x128xf32>
    %cst_12 = arith.constant 1.000000e+00 : f32
    %20 = vector.broadcast %cst_12 : f32 to vector<8x128xf32>
    %21 = arith.subf %20, %19 : vector<8x128xf32>
    %cst_13 = arith.constant 2.000000e-01 : f32
    %22 = vector.broadcast %cst_13 : f32 to vector<8x128xf32>
    %23 = arith.mulf %22, %21 : vector<8x128xf32>
    %24 = arith.mulf %18, %23 : vector<8x128xf32>
    %25 = arith.addf %24, %17 : vector<8x128xf32>
    %cst_14 = arith.constant 5.000000e-01 : f32
    %26 = vector.broadcast %cst_14 : f32 to vector<8x128xf32>
    %27 = arith.cmpf ogt, %25, %26 : vector<8x128xf32>
    %28 = arith.extui %27 : vector<8x128xi1> to vector<8x128xi32>
    %29 = arith.sitofp %28 : vector<8x128xi32> to vector<8x128xf32>
    %c0_15 = arith.constant 0 : index
    %c0_16 = arith.constant 0 : index
    %30 = vector.load %arg10[%c0_15, %c0_16] : memref<8x128xf32, #tpu.memory_space<vmem>>, vector<8x128xf32>
    tpu.vector_store %arg10[%c0_15, %c0_16], %25 {strides = array<i32>} : memref<8x128xf32, #tpu.memory_space<vmem>>, vector<8x128xf32>,
    %c0_17 = arith.constant 0 : index
    %c0_18 = arith.constant 0 : index
    %31 = vector.load %arg11[%c0_17, %c0_18] : memref<8x128xf32, #tpu.memory_space<vmem>>, vector<8x128xf32>
    tpu.vector_store %arg11[%c0_17, %c0_18], %29 {strides = array<i32>} : memref<8x128xf32, #tpu.memory_space<vmem>>, vector<8x128xf32>,
    %c0_19 = arith.constant 0 : index
    %c0_20 = arith.constant 0 : index
    %32 = vector.load %arg12[%c0_19, %c0_20] : memref<8x128xf32, #tpu.memory_space<vmem>>, vector<8x128xf32>
    %33 = arith.addf %32, %29 : vector<8x128xf32>
    %c0_21 = arith.constant 0 : index
    %c0_22 = arith.constant 0 : index
    %34 = vector.load %arg12[%c0_21, %c0_22] : memref<8x128xf32, #tpu.memory_space<vmem>>, vector<8x128xf32>
    tpu.vector_store %arg12[%c0_21, %c0_22], %33 {strides = array<i32>} : memref<8x128xf32, #tpu.memory_space<vmem>>, vector<8x128xf32>,
    %35 = arith.truncf %29 : vector<8x128xf32> to vector<8x128xbf16>
    %c0_23 = arith.constant 0 : index
    %c0_24 = arith.constant 0 : index
    %c0_25 = arith.constant 0 : index
    %36 = vector.load %arg9[%c0_23, %c0_24, %c0_25] : memref<1x8x128xbf16, #tpu.memory_space<vmem>>, vector<1x8x128xbf16>
    %37 = vector.shape_cast %36 : vector<1x8x128xbf16> to vector<8x128xbf16>
    %38 = vector.shape_cast %35 : vector<8x128xbf16> to vector<1x8x128xbf16>
    tpu.vector_store %arg9[%c0_23, %c0_24, %c0_25], %38 {strides = array<i32>} : memref<1x8x128xbf16, #tpu.memory_space<vmem>>, vector<1x8x128xbf16>,
    return
  }
  func.func @transform_0(%arg0: i32, %arg1: i32, %arg2: i32) -> (i32, i32, i32) {
    %c0_i32 = arith.constant 0 : i32
    %c0_i32_0 = arith.constant 0 : i32
    return %arg2, %arg0, %c0_i32 : i32, i32, i32
  }
  func.func @transform_1(%arg0: i32, %arg1: i32, %arg2: i32) -> (i32, i32) {
    %c0_i32 = arith.constant 0 : i32
    %c0_i32_0 = arith.constant 0 : i32
    return %c0_i32, %arg1 : i32, i32
  }
  func.func @transform_2(%arg0: i32, %arg1: i32, %arg2: i32) -> (i32, i32) {
    %c0_i32 = arith.constant 0 : i32
    %c0_i32_0 = arith.constant 0 : i32
    return %c0_i32, %arg1 : i32, i32
  }
  func.func @transform_3(%arg0: i32, %arg1: i32, %arg2: i32) -> (i32, i32) {
    %c0_i32 = arith.constant 0 : i32
    return %arg0, %arg1 : i32, i32
  }
  func.func @transform_4(%arg0: i32, %arg1: i32, %arg2: i32) -> (i32, i32) {
    %c0_i32 = arith.constant 0 : i32
    return %arg0, %arg1 : i32, i32
  }
  func.func @transform_5(%arg0: i32, %arg1: i32, %arg2: i32) -> (i32, i32) {
    %c0_i32 = arith.constant 0 : i32
    return %arg0, %arg1 : i32, i32
  }
  func.func @transform_6(%arg0: i32, %arg1: i32, %arg2: i32) -> (i32, i32, i32) {
    %c0_i32 = arith.constant 0 : i32
    return %arg2, %arg0, %arg1 : i32, i32, i32
  }
  func.func @transform_7(%arg0: i32, %arg1: i32, %arg2: i32) -> (i32, i32) {
    %c0_i32 = arith.constant 0 : i32
    return %arg0, %arg1 : i32, i32
  }
  func.func @transform_8(%arg0: i32, %arg1: i32, %arg2: i32) -> (i32, i32) {
    %c0_i32 = arith.constant 0 : i32
    return %arg0, %arg1 : i32, i32
  }
  func.func @transform_9(%arg0: i32, %arg1: i32, %arg2: i32) -> (i32, i32) {
    %c0_i32 = arith.constant 0 : i32
    return %arg0, %arg1 : i32, i32
  }
}

</mosaic_0001>

<bundles_post_ra>
// kernel: snn_linear_forward.1
= control target key start
LH: loop header
LB: loop body
LE: loop exit
PB: predicated region body
PF: predicated region fallthrough
CT: control target
= control target key end

     0   :  { %15 = vsyncpa [#allocation3], 0  ;;  %s1680_s30 = smov 0   ;;  %s1682_s10 = smov 0   ;;  %s1814_s0 = inlined_call_operand.vmem [shape: bf16[2,8,640], index: 0, kind: input, shape index: {}]   ;;  %s1815_s1 = inlined_call_operand.hbm [shape: bf16[640,128], index: 1, kind: input, shape index: {}]   ;;  %s1816_s2 = inlined_call_operand.vmem [shape: f32[1,128], index: 2, kind: input, shape index: {}]   ;;  %s1817_s3 = inlined_call_operand.vmem [shape: f32[8,128], index: 3, kind: input, shape index: {}, may-alias: {3,7}]   ;;  %s1818_s4 = inlined_call_operand.vmem [shape: f32[8,128], index: 4, kind: input, shape index: {}, may-alias: {4,8}]   ;;  %s1819_s5 = inlined_call_operand.vmem [shape: f32[8,128], index: 5, kind: input, shape index: {}, may-alias: {5,9}]   ;;  %s1820_s6 = inlined_call_operand.vmem [shape: bf16[2,8,128], index: 6, kind: output, shape index: {0}]   ;;  %s1821_s7 = inlined_call_operand.vmem [shape: f32[8,128], index: 7, kind: output, shape index: {1}, may-alias: {3,7}]   ;;  %s1822_s8 = inlined_call_operand.vmem [shape: f32[8,128], index: 8, kind: output, shape index: {2}, may-alias: {4,8}]   ;;  %s1823_s9 = inlined_call_operand.vmem [shape: f32[8,128], index: 9, kind: output, shape index: {3}, may-alias: {5,9}]  }
   0x1   :  { %s1684_s11 = smov 0  }
   0x2 LB: > { %s1345_s12 = sadd.s32 4294967295, %s1623_s11   ;;  %s33_s13 = sadd.s32 1, %s1619_s10  ;;  %s1623_s11 = sphi %s1684_s11, %s21_s11   ;;  %s1619_s10 = sphi %s1682_s10, %s1833_s10   ;;  %s1615_s30 = sphi %s1680_s30, %s1832_s30  }
   0x3   : > { %p34_p0 = scmp.ge.s32.totalorder %s33_s13, 2  ;;  %p1347_p1 = scmp.ge.s32.totalorder %s1623_s11, 1 }
   0x4   : > { %p323_p2 = scmp.lt.s32.totalorder %s1623_s11, 3  ;;  %p1705_p4 = scmp.eq.s32.totalorder %s1345_s12, 0 }
   0x5   : > { %s1835_s13 = smov (%p34_p0, %s33_s13), 0  ;;  %s1625_s16 = smov [#allocation2]  }
   0x6   : > { %p1701_p3 = pnand %p1347_p1, %p323_p2  ;;  %s337_s17 = sshll.u32 %s1625_s16, 4  ;;  %s338_s17 = int_to_ptr.vmem [resolvable:$true] %s337_s17 }
   0x7   : > { %s1828_s15 = scalar_select %p1705_p4, 1, 0 }
   0x8   : > { %s1827_s14 = scalar_select %p1701_p3, 1, 0 }
   0x9   : > { %p1489_p5 = pneg %p1701_p3  ;;  %s1569_s21 = scalar_lea.hbm %s1815_s1, 5120 }
   0xa   : > { %p1570_p7 = scmp.ne.s32.totalorder %s1815_s1, %s1569_s21  ;;  %p1576_p11 = scmp.lt.u32.totalorder %s1569_s21, %s1815_s1 }
   0xb   : > { %p1713_p6 = pnand %p1705_p4, %p1489_p5 }
   0xd   : > { %p1571_p8 = pneg %p1713_p6 }
   0xf   : > { %p1572_p9 = pnand %p1571_p8, %p1570_p7 }
  0x11   : > { %p1573_p10 = pneg %p1572_p9 }
  0x13   : > { %p1578_p12 = pnand %p1576_p11, %p1573_p10 }
  0x15   : > { %1581 = shalt.err (!%p1578_p12)
}
  0x16   : > { %s1582_s26 = scalar_lea.vmem %s338_s17, 5120  ;;  %p1590_p2 = scmp.lt.s32.totalorder %s338_s17, %s338_s17 }
  0x17   : > { %p1583_p13 = scmp.ne.s32.totalorder %s338_s17, %s1582_s26  ;;  %p1591_p5 = scmp.lt.s32.totalorder %s1582_s26, %s1582_s26 }
  0x19   : > { %p1585_p0 = pnand %p1583_p13, %p1571_p8  ;;  %p1592_p4 = por %p1591_p5, %p1590_p2 }
  0x1b   : > { %p1586_p1 = pneg %p1585_p0 }
  0x1d   : > { %p1593_p3 = pnand %p1592_p4, %p1586_p1 }
  0x1f   : > { %1596 = shalt.err (!%p1593_p3)
}
  0x20   : > { %s1626_s27 = smov 64   ;;  %s1627_s28 = smov 4  }
  0x21   : > { %1492 = dma.hbm_to_vmem [thread:$0]  (!%p1713_p6), %s1815_s1, 5120, %s338_s17, [#allocation3], %s1626_s27, %s1626_s27, %s1627_s28  }
  0x22   : > { %p1830_p7 = scmp.ne.s32.totalorder %s1827_s14, 0 }
  0x23   : > { %p1831_p9 = scmp.ne.s32.totalorder (!%p1830_p7), %s1828_s15, 0 }
  0x24   : > { %401 = sbr.rel (%p1830_p7) target bundleno = 341 (0x155), region = 44 }
  0x2b   : > { %1610 = dma.done.wait (%p1831_p9), [#allocation3], 5120  }
  0x2c   : > { %1612 = vsyncadd (%p1831_p9), [#allocation3], 4294962176  ;;  %p491_p3 = scmp.lt.s32.totalorder %s1615_s30, 1  ;;  %p1358_p4 = scmp.ne.s32.totalorder %s1615_s30, 0 }
  0x2d   : > { %v560_v0 = vld [vmem:[%s1817_s3] sm:$0xff] (!%p1358_p4) }
  0x2e   : > { %s492_s16 = scalar_select %p491_p3, %s1615_s30, 1 }
  0x2f   : > { %559 = sbr.rel (%p1358_p4) target bundleno = 54 (0x36), region = 52  ;;  %v562_v1 = vld [vmem:[%s1818_s4] sm:$0xff] (!%p1358_p4)  ;;  %561 = vst [vmem:[%s1821_s7] sm:$0xff] (!%p1358_p4), %v560_v0 }
  0x30   : > { %s1484_s19 = smul.u32 20, %s492_s16  ;;  %s1357_s20 = sshll.u32 %s492_s16, 2  ;;  %v564_v2 = vld [vmem:[%s1819_s5] sm:$0xff] (!%p1358_p4)  ;;  %563 = vst [vmem:[%s1822_s8] sm:$0xff] (!%p1358_p4), %v562_v1 }
  0x31   : > { %s1744_s22 = scalar_lea.vmem %s1820_s6, %s1357_s20  ;;  %565 = vst [vmem:[%s1823_s9] sm:$0xff] (!%p1358_p4), %v564_v2 }
  0x32   : > { %s1749_s23 = scalar_lea.vmem %s1814_s0, %s1484_s19 }
  0x36 PF: > { %v1524_v3 = vld [vmem:[#allocation2 + $0x40] sm:$0xff]   ;;  %v1528_v7 = vld [vmem:[#allocation2 + $0x48] sm:$0xff]   ;;  %v1532_v11 = vld [vmem:[#allocation2 + $0x50] sm:$0xff]   ;;  %v1628_v38 = vmov 0.0   ;;  %vm1629_vm0 = vmmov 0   ;;  %v1035_v1 = vlaneseq }
  0x37   : > { %v1525_v4 = vld [vmem:[#allocation2] sm:$0xff]   ;;  %1411 = vmatprep.subr.bf16.mxu0 %v1524_v3  ;;  %v1529_v8 = vld [vmem:[#allocation2 + $0x8] sm:$0xff]   ;;  %v1533_v12 = vld [vmem:[#allocation2 + $0x10] sm:$0xff]  }
  0x38   : > { %v1526_v5 = vld [vmem:[#allocation2 + $0xc0] sm:$0xff]   ;;  %1412 = vmatpush3.bf16.msra.mxu0 %v1525_v4  ;;  %v1530_v9 = vld [vmem:[#allocation2 + $0xc8] sm:$0xff]   ;;  %v1534_v13 = vld [vmem:[#allocation2 + $0xd0] sm:$0xff]   ;;  %v1036_v3 = vshrl.u32 %v1035_v1, 7 }
  0x39   : > { %v1527_v6 = vld [vmem:[#allocation2 + $0x80] sm:$0xff]   ;;  %1433 = vmatprep.subr.bf16.mxu1 %v1526_v5  ;;  %1413 = vmatprep.subr.bf16.mxu0 %v1528_v7  ;;  %v1531_v10 = vld [vmem:[#allocation2 + $0x88] sm:$0xff]   ;;  %v1535_v14 = vld [vmem:[#allocation2 + $0x90] sm:$0xff]  }
  0x3a   : > { %1434 = vmatpush3.bf16.msra.mxu1 %v1527_v6  ;;  %v1536_v15 = vld [vmem:[#allocation2 + $0x58] sm:$0xff]   ;;  %v1540_v19 = vld [vmem:[#allocation2 + $0x60] sm:$0xff]   ;;  %v1544_v23 = vld [vmem:[#allocation2 + $0x68] sm:$0xff]   ;;  %vm1039_vm1 = vcmp.lt.s32.totalorder %v1036_v3, 4 }
  0x3b   : > { %1435 = vmatprep.subr.bf16.mxu1 %v1530_v9  ;;  %v1537_v16 = vld [vmem:[#allocation2 + $0x18] sm:$0xff]   ;;  %v1541_v20 = vld [vmem:[#allocation2 + $0x20] sm:$0xff]   ;;  %v1545_v24 = vld [vmem:[#allocation2 + $0x28] sm:$0xff]  }
  0x3c   : > { %1414 = vmatpush3.bf16.msra.mxu0 %v1529_v8  ;;  %v1538_v17 = vld [vmem:[#allocation2 + $0xd8] sm:$0xff]   ;;  %v1542_v21 = vld [vmem:[#allocation2 + $0xe0] sm:$0xff]   ;;  %v1546_v25 = vld [vmem:[#allocation2 + $0xe8] sm:$0xff]  }
  0x3d   : > { %1415 = vmatprep.subr.bf16.mxu0 %v1532_v11  ;;  %v1539_v18 = vld [vmem:[#allocation2 + $0x98] sm:$0xff]   ;;  %v1543_v22 = vld [vmem:[#allocation2 + $0xa0] sm:$0xff]   ;;  %v1547_v26 = vld [vmem:[#allocation2 + $0xa8] sm:$0xff]  }
  0x3e   : > { %1436 = vmatpush3.bf16.msra.mxu1 %v1531_v10  ;;  %v1548_v27 = vld [vmem:[#allocation2 + $0x70] sm:$0xff]   ;;  %v1552_v31 = vld [vmem:[#allocation2 + $0x78] sm:$0xff]   ;;  %v566_v34 = vld [vmem:[%s1749_s23] sm:$0xff] }
  0x3f   : > { %1437 = vmatprep.subr.bf16.mxu1 %v1534_v13  ;;  %v1549_v28 = vld [vmem:[#allocation2 + $0x30] sm:$0xff]   ;;  %v1553_v32 = vld [vmem:[#allocation2 + $0x38] sm:$0xff]   ;;  %v1360_v35 = vcombine.low %v566_v34, %v566_v34  ;;  %v1361_v36 = vcombine.high %v566_v34, %v566_v34  ;;  %v567_v39 = vld [vmem:[%s1749_s23 + $0x8] sm:$0xff] }
  0x40   : > { %1416 = vmatpush3.bf16.msra.mxu0 %v1533_v12  ;;  %v1550_v29 = vld [vmem:[#allocation2 + $0xf0] sm:$0xff]   ;;  %v1554_v33 = vld [vmem:[#allocation2 + $0xf8] sm:$0xff]   ;;  %v1362_v40 = vcombine.low %v567_v39, %v567_v39  ;;  %v1363_v41 = vcombine.high %v567_v39, %v567_v39  ;;  %v1560_v42 = vld [vmem:[#allocation2 + $0x100] sm:$0xff]  }
  0x41   : > { %1417 = vmatprep.subr.bf16.mxu0 %v1536_v15  ;;  %v1551_v30 = vld [vmem:[#allocation2 + $0xb0] sm:$0xff]   ;;  %v1557_v37 = vld [vmem:[#allocation2 + $0xb8] sm:$0xff]   ;;  %946 = vmatprep.mubr.bf16.mxu0 %v1361_v36  ;;  %v1561_v43 = vld [vmem:[#allocation2 + $0x108] sm:$0xff]  }
  0x42   : > { %1438 = vmatpush3.bf16.msra.mxu1 %v1535_v14  ;;  %986 = vmatprep.mubr.bf16.mxu1 %v1363_v41  ;;  %v1562_v44 = vld [vmem:[#allocation2 + $0x110] sm:$0xff]   ;;  %v1563_v45 = vld [vmem:[#allocation2 + $0x118] sm:$0xff]   ;;  %v1564_v46 = vld [vmem:[#allocation2 + $0x120] sm:$0xff]  }
  0x43   : > { %1439 = vmatprep.subr.bf16.mxu1 %v1538_v17  ;;  %v1565_v47 = vld [vmem:[#allocation2 + $0x128] sm:$0xff]   ;;  %v1566_v48 = vld [vmem:[#allocation2 + $0x130] sm:$0xff]   ;;  %v1567_v49 = vld [vmem:[#allocation2 + $0x138] sm:$0xff]  }
  0x44   : > { %1418 = vmatpush3.bf16.msra.mxu0 %v1537_v16  ;;  %v1568_v50 = vld [vmem:[%s1749_s23 + $0x10] ss:$0 sps:$4 sm:$0xff]   ;;  %v1359_v52 = vld [vmem:[%s1816_s2] ss:$0 sm:$0xff] }
  0x45   : > { %1419 = vmatprep.subr.bf16.mxu0 %v1540_v19  ;;  %v1042_v0 = vld [vmem:[%s1822_s8] sm:$0xff] }
  0x46   : > { %1440 = vmatpush3.bf16.msra.mxu1 %v1539_v18  ;;  %v1043_v2 = vsub.f32 1.0, %v1042_v0  ;;  %v1041_v5 = vld [vmem:[%s1821_s7] sm:$0xff] }
  0x47   : > { %1441 = vmatprep.subr.bf16.mxu1 %v1542_v21  ;;  %v1052_v14 = vld [vmem:[%s1823_s9] sm:$0xff] }
  0x48   : > { %1420 = vmatpush3.bf16.msra.mxu0 %v1541_v20  ;;  %v1044_v4 = vmul.f32 0.2, %v1043_v2 }
  0x49   : > { %1421 = vmatprep.subr.bf16.mxu0 %v1544_v23 }
  0x4a   : > { %1442 = vmatpush3.bf16.msra.mxu1 %v1543_v22  ;;  %v1045_v7 = vmul.f32 %v1044_v4, %v1041_v5 }
  0x4b   : > { %1443 = vmatprep.subr.bf16.mxu1 %v1546_v25 }
  0x4c   : > { %1422 = vmatpush3.bf16.msra.mxu0 %v1545_v24 }
  0x4d   : > { %1423 = vmatprep.subr.bf16.mxu0 %v1548_v27 }
  0x4e   : > { %1444 = vmatpush3.bf16.msra.mxu1 %v1547_v26 }
  0x4f   : > { %1445 = vmatprep.subr.bf16.mxu1 %v1550_v29 }
  0x50   : > { %1424 = vmatpush3.bf16.msra.mxu0 %v1549_v28 }
  0x51   : > { %1425 = vmatprep.subr.bf16.mxu0 %v1552_v31 }
  0x52   : > { %1446 = vmatpush3.bf16.msra.mxu1 %v1551_v30 }
  0x53   : > { %1447 = vmatprep.subr.bf16.mxu1 %v1554_v33 }
  0x54   : > { %1426 = vmatpush3.bf16.msra.mxu0 %v1553_v32 }
  0x55   : > { %1464 = vmatprep.subr.bf16.mxu0 %v1628_v38 }
  0x56   : > { %1448 = vmatpush3.bf16.msra.mxu1 %v1557_v37 }
  0x57   : > { %947 = vmatmul.mubr.bf16.vlgmr.msra.gmra.mrb[0].mxu0 %v1360_v35 }
  0x58   : > { %1465 = vmatpush3.bf16.msra.mxu0 %v1560_v42  ;;  %1480 = vmatprep.mubr.msk.bf16.mxu0 %vm1629_vm0, %v1628_v38 }
  0x59   : > { %987 = vmatmul.mubr.bf16.vlgmr.msra.gmra.mrb[0].mxu1 %v1362_v40  ;;  %1466 = vmatprep.subr.bf16.mxu0 %v1628_v38 }
  0x5c   : > { %1467 = vmatpush3.bf16.msra.mxu0 %v1561_v43 }
  0x5d   : > { %1468 = vmatprep.subr.bf16.mxu0 %v1628_v38 }
  0x60   : > { %1469 = vmatpush3.bf16.msra.mxu0 %v1562_v44 }
  0x61   : > { %1470 = vmatprep.subr.bf16.mxu0 %v1628_v38 }
  0x64   : > { %1471 = vmatpush3.bf16.msra.mxu0 %v1563_v45 }
  0x65   : > { %1472 = vmatprep.subr.bf16.mxu0 %v1628_v38 }
  0x68   : > { %1473 = vmatpush3.bf16.msra.mxu0 %v1564_v46 }
  0x69   : > { %1474 = vmatprep.subr.bf16.mxu0 %v1628_v38 }
  0x6c   : > { %1475 = vmatpush3.bf16.msra.mxu0 %v1565_v47 }
  0x6d   : > { %1476 = vmatprep.subr.bf16.mxu0 %v1628_v38 }
  0x70   : > { %1477 = vmatpush3.bf16.msra.mxu0 %v1566_v48 }
  0x71   : > { %1478 = vmatprep.subr.bf16.mxu0 %v1628_v38 }
  0x74   : > { %1479 = vmatpush3.bf16.msra.mxu0 %v1567_v49 }
  0x77   : > { %1481 = vmatmul.mubr.bf16.vlgmr.msra.gmra.mrb[4].mxu0 %v1568_v50 }
 0x12a   : > { %v1427_v51 = vpop.f32.mrb[0].mxu0 }
 0x12b   : > { %v1428_v53 = vpop.f32.mrb[1].mxu0 }
 0x12c   : > { %v1429_v54 = vadd.f32 %v1428_v53, %v1427_v51  ;;  %v1430_v55 = vpop.f32.mrb[2].mxu0  ;;  %v1449_v56 = vpop.f32.mrb[0].mxu1 }
 0x12d   : > { %v1431_v57 = vpop.f32.mrb[3].mxu0  ;;  %v1450_v58 = vpop.f32.mrb[1].mxu1 }
 0x12e   : > { %v949_v59 = vadd.f32 %v1429_v54, %v1359_v52  ;;  %v1451_v60 = vadd.f32 %v1450_v58, %v1449_v56  ;;  %v1452_v61 = vpop.f32.mrb[2].mxu1 }
 0x12f   : > { %v1453_v62 = vpop.f32.mrb[3].mxu1 }
 0x130   : > { %v989_v63 = vadd.f32 %v1451_v60, %v949_v59 }
 0x14a   : > { %v1028_v6 = vpop.f32.mrb[4].mxu0 }
 0x14b   : > { %v1029_v8 = vadd.f32 %v1028_v6, %v989_v63  ;;  %v1482_v9 = vpop.f32.mrb[5].mxu0 }
 0x14c   : > { %v1031_v10 = vpop.f32.mrb[6].mxu0 }
 0x14d   : > { %v1040_v11 = vsel %vm1039_vm1, %v1029_v8, 0.0  ;;  %v1483_v12 = vpop.f32.mrb[7].mxu0 }
 0x14e   : > { %v1046_v13 = vadd.f32 %v1045_v7, %v1040_v11 }
 0x150   : > { %vm1047_vm2 = vcmp.gt.f32.partialorder %v1046_v13, 0.5  ;;  %1050 = vst [vmem:[%s1821_s7] sm:$0xff] %v1046_v13 }
 0x151   : > { %v1405_v15 = vsel %vm1047_vm2, 1.0, %v1628_v38 }
 0x152   : > { %1051 = vst [vmem:[%s1822_s8] sm:$0xff] %v1405_v15  ;;  %v1053_v16 = vadd.f32 %v1405_v15, %v1052_v14  ;;  %v1055_v17 = vpack.c.bf16 %v1405_v15, %v1405_v15 }
 0x154   : > { %1054 = vst [vmem:[%s1823_s9] sm:$0xff] %v1053_v16  ;;  %1056 = vst [vmem:[%s1744_s22] sm:$0xf] %v1055_v17 }
 0x155 PF: > { %s21_s11 = sadd.s32 1, %s1623_s11   ;;  %s1832_s30 = smov %s1619_s10 }
 0x156   : > { %p18_p6 = scmp.ge.s32.totalorder %s21_s11, 4   ;;  %s1833_s10 = smov %s1835_s13 }
 0x158   :  { %20 = sbr.rel (!%p18_p6) target bundleno = 2 (0x2), region = 132 }
 0x15f   :  { %1148 = vsyncpa [#allocation3], 1 }
 0x160   :  { %1150 = vsyncpa [#allocation3 + $0x1], 1 }

</bundles_post_ra>
